<compile_context>
chip_gen: v6e
topology: v6e:2x2x1
jax: 0.10.0
libtpu: 0.0.40
codegen_flags: <defaults>
</compile_context>

<pallas_src>
import jax
import jax.numpy as jnp
from jax.experimental import pallas as pl
from jax.experimental.pallas import tpu as pltpu

# Model dims from the PyTorch module: (fan_in, fan_out) per Linear layer.
LAYER_DIMS = [(10, 20), (20, 20), (20, 10), (10, 5)]
N_LAYERS = len(LAYER_DIMS)
IN_DIM = LAYER_DIMS[0][0]       # 10
OUT_DIM = LAYER_DIMS[-1][1]     # 5

LANES = 128                     # lane width of all kernel blocks
GROUP = 32                      # lanes per packed sample (>= max feature dim 20)
PACK = LANES // GROUP           # 4 samples per 128-lane row

MAX_TILE_ROWS = 2048            # packed rows per grid step (= 8192 samples)
MIN_SPLIT_ROWS = 256            # split into >=2 tiles above this (v7x: use both TCs)


def _cdiv(a, b):
    return (a + b - 1) // b


def _round_up(n, m):
    return ((n + m - 1) // m) * m


def toy_mlp_kernel(x_ref, w_ref, b_ref, o_ref):
    """Fused 4-layer MLP (ReLU after layers 1-3, none after layer 4) on packed tiles.

    x_ref : (tile_rows, 128) bf16 -- 4 samples per row, 32 lanes each (zero-padded features)
    w_ref : (4, 128, 128)    bf16 -- per-layer block-diagonal weights (VMEM resident)
    b_ref : (4, 1, 128)      f32  -- per-layer bias, tiled across the 4 sample groups
    o_ref : (tile_rows, 128) f32  -- 4 samples per row; lanes >= 5 of each group are zero
    """
    h = x_ref[...]
    for l in range(N_LAYERS):
        w = w_ref[l]                       # (128, 128) bf16, block diagonal
        b = b_ref[l]                       # (1, 128) f32
        h = jnp.dot(h.astype(jnp.bfloat16), w,
                    preferred_element_type=jnp.float32) + b
        if l != N_LAYERS - 1:              # final Linear(10, 5) has no ReLU
            h = jnp.maximum(h, 0.0)
    o_ref[...] = h.astype(o_ref.dtype)


def pack_params(params):
    """One-time parameter prep (hoisted out of the forward pass).

    Each PyTorch-layout weight (out, in) is transposed to (in, out), zero-padded to
    (32, 32) and replicated 4x along the diagonal of a (128, 128) slab so that each
    32-lane sample group multiplies its own copy. Biases are zero-padded to 32 lanes
    and tiled 4x. Weights are stored bf16 (MXU inputs); biases stay f32 (added to the
    f32 accumulator). Zero padding keeps the unused lanes exactly zero through every
    layer, so no masking is needed in the kernel.
    """
    w_packed = jnp.zeros((N_LAYERS, LANES, LANES), jnp.float32)
    b_packed = jnp.zeros((N_LAYERS, 1, LANES), jnp.float32)
    for l, (fan_in, fan_out) in enumerate(LAYER_DIMS):
        w_t = params[f"w{l + 1}"].astype(jnp.float32).T     # (in, out)
        b = params[f"b{l + 1}"].astype(jnp.float32)         # (out,)
        for g in range(PACK):
            r0 = g * GROUP
            w_packed = w_packed.at[l, r0:r0 + fan_in, r0:r0 + fan_out].set(w_t)
            b_packed = b_packed.at[l, 0, r0:r0 + fan_out].set(b)
    return w_packed.astype(jnp.bfloat16), b_packed


@jax.jit
def toy_model_forward(x, w_packed, b_packed):
    """x: (B, 10) f32; w_packed/b_packed: outputs of pack_params(). Returns (B, 5) f32."""
    B = x.shape[0]
    rows = _cdiv(B, PACK)                          # packed rows needed (4 samples/row)

    # Balanced tiling: padding bounded to <8 rows/tile; >=2 tiles when big enough so the
    # "parallel" grid axis can actually be split across v7x's two TensorCores.
    n_tiles = _cdiv(rows, MAX_TILE_ROWS)
    if rows >= MIN_SPLIT_ROWS:
        n_tiles = max(n_tiles, 2)
    tile_rows = _round_up(_cdiv(rows, n_tiles), 8)
    padded_rows = n_tiles * tile_rows
    padded_b = padded_rows * PACK

    # Pack: pad batch and features (10 -> 32), 4 samples per 128-lane row, cast to bf16.
    x_pad = jnp.pad(x, ((0, padded_b - B), (0, GROUP - IN_DIM)))
    x_pack = x_pad.reshape(padded_rows, LANES).astype(jnp.bfloat16)

    # VMEM budget: double-buffered in+out blocks + resident weights + slack.
    block_bytes = tile_rows * LANES * 4
    vmem_limit = int(min(48 << 20, max(16 << 20, 8 * block_bytes + (4 << 20))))

    out = pl.pallas_call(
        toy_mlp_kernel,
        out_shape=jax.ShapeDtypeStruct((padded_rows, LANES), jnp.float32),
        grid=(n_tiles,),
        in_specs=[
            # Batch-tiled, lane-dense activations.
            pl.BlockSpec((tile_rows, LANES), lambda i: (i, 0)),
            # Constant block index -> weights/biases DMA'd once, stay VMEM resident.
            pl.BlockSpec((N_LAYERS, LANES, LANES), lambda i: (0, 0, 0)),
            pl.BlockSpec((N_LAYERS, 1, LANES), lambda i: (0, 0, 0)),
        ],
        out_specs=pl.BlockSpec((tile_rows, LANES), lambda i: (i, 0)),
        compiler_params=pltpu.CompilerParams(
            dimension_semantics=("parallel",),
            vmem_limit_bytes=vmem_limit),
    )(x_pack, w_packed, b_packed)

    # Un-pack: (rows, 128) -> (rows*4, 32), drop batch padding and padded feature lanes.
    return out.reshape(padded_b, GROUP)[:B, :OUT_DIM]


def init_params(key):
    """Deterministic init mimicking nn.Linear default (uniform(-1/sqrt(fan_in), 1/sqrt(fan_in)))."""
    params = {}
    for i, (fan_in, fan_out) in enumerate(LAYER_DIMS, start=1):
        key, kw, kb = jax.random.split(key, 3)
        bound = 1.0 / jnp.sqrt(jnp.float32(fan_in))
        # PyTorch-style storage: weight shape (out, in), bias shape (out,)
        params[f"w{i}"] = jax.random.uniform(
            kw, (fan_out, fan_in), jnp.float32, minval=-bound, maxval=bound)
        params[f"b{i}"] = jax.random.uniform(
            kb, (fan_out,), jnp.float32, minval=-bound, maxval=bound)
    return params


def reference_forward(x, params):
    """Pure-JAX f32 reference for correctness check."""
    h = jnp.maximum(x @ params["w1"].T + params["b1"], 0.0)
    h = jnp.maximum(h @ params["w2"].T + params["b2"], 0.0)
    h = jnp.maximum(h @ params["w3"].T + params["b3"], 0.0)
    return h @ params["w4"].T + params["b4"]


if __name__ == "__main__":
    key = jax.random.PRNGKey(0)
    params = init_params(key)
    w_packed, b_packed = pack_params(params)

    def check(batch, k):
        x = jax.random.normal(k, (batch, IN_DIM), jnp.float32)
        out = jax.block_until_ready(toy_model_forward(x, w_packed, b_packed))
        ref = reference_forward(x, params)
        assert out.shape == (batch, OUT_DIM), out.shape
        max_err = float(jnp.max(jnp.abs(out - ref)))
        # bf16 MXU inputs (f32 accumulation) -> looser tolerance than the old pure-f32 path.
        assert jnp.allclose(out, ref, atol=5e-2, rtol=5e-2), (
            f"mismatch vs reference (batch={batch}), max abs err={max_err}")

    key, k1, k2, k3 = jax.random.split(key, 4)
    check(8, k1)      # small primary test (matches the original toy usage)
    check(37, k2)     # ragged: not a multiple of PACK; exercises pad / un-pack path
    check(1050, k3)   # exercises the balanced two-tile ("parallel" grid) path

    print("KERNEL_OK")
</pallas_src>

<mosaic_0001>
module attributes {stable_mosaic.version = 11 : i64} {
  func.func @toy_mlp_kernel(%arg0: i32, %arg1: memref<8x128xbf16, #tpu.memory_space<vmem>>, %arg2: memref<4x128x128xbf16, #tpu.memory_space<vmem>>, %arg3: memref<4x1x128xf32, #tpu.memory_space<vmem>>, %arg4: memref<8x128xf32, #tpu.memory_space<vmem>>) attributes {dimension_semantics = [#tpu.dimension_semantics<parallel>], iteration_bounds = array<i64: 1>, scalar_prefetch = 0 : i64, scratch_operands = 0 : i64, tpu.core_type = #tpu.core_type<tc>, window_params = [{transform_indices = @transform_0, window_bounds = array<i64: 8, 128>}, {pipeline_mode = #tpu.pipeline_mode<synchronous>, transform_indices = @transform_1, window_bounds = array<i64: 4, 128, 128>}, {pipeline_mode = #tpu.pipeline_mode<synchronous>, transform_indices = @transform_2, window_bounds = array<i64: 4, 1, 128>}, {transform_indices = @transform_3, window_bounds = array<i64: 8, 128>}]} {
    %c0 = arith.constant 0 : index
    %c0_0 = arith.constant 0 : index
    %0 = vector.load %arg1[%c0, %c0_0] : memref<8x128xbf16, #tpu.memory_space<vmem>>, vector<8x128xbf16>
    %c0_1 = arith.constant 0 : index
    %c0_2 = arith.constant 0 : index
    %c0_3 = arith.constant 0 : index
    %1 = vector.load %arg2[%c0_1, %c0_2, %c0_3] : memref<4x128x128xbf16, #tpu.memory_space<vmem>>, vector<1x128x128xbf16>
    %2 = vector.shape_cast %1 : vector<1x128x128xbf16> to vector<128x128xbf16>
    %c0_4 = arith.constant 0 : index
    %c0_5 = arith.constant 0 : index
    %c0_6 = arith.constant 0 : index
    %3 = vector.load %arg3[%c0_4, %c0_5, %c0_6] : memref<4x1x128xf32, #tpu.memory_space<vmem>>, vector<1x1x128xf32>
    %4 = vector.shape_cast %3 : vector<1x1x128xf32> to vector<1x128xf32>
    %cst = arith.constant dense<0.000000e+00> : vector<8x128xf32>
    %5 = tpu.matmul %0, %2, %cst {dimension_numbers = #tpu.dot_dimension_numbers<[1], [0], [0], [1], [0, 0, 1, 1], [], []>} : vector<8x128xbf16>, vector<128x128xbf16>, vector<8x128xf32> -> vector<8x128xf32>
    %6 = vector.broadcast %4 : vector<1x128xf32> to vector<8x128xf32>
    %7 = arith.addf %5, %6 : vector<8x128xf32>
    %cst_7 = arith.constant 0.000000e+00 : f32
    %8 = vector.broadcast %cst_7 : f32 to vector<8x128xf32>
    %9 = arith.maximumf %7, %8 : vector<8x128xf32>
    %c1 = arith.constant 1 : index
    %c0_8 = arith.constant 0 : index
    %c0_9 = arith.constant 0 : index
    %10 = vector.load %arg2[%c1, %c0_8, %c0_9] : memref<4x128x128xbf16, #tpu.memory_space<vmem>>, vector<1x128x128xbf16>
    %11 = vector.shape_cast %10 : vector<1x128x128xbf16> to vector<128x128xbf16>
    %c1_10 = arith.constant 1 : index
    %c0_11 = arith.constant 0 : index
    %c0_12 = arith.constant 0 : index
    %12 = vector.load %arg3[%c1_10, %c0_11, %c0_12] : memref<4x1x128xf32, #tpu.memory_space<vmem>>, vector<1x1x128xf32>
    %13 = vector.shape_cast %12 : vector<1x1x128xf32> to vector<1x128xf32>
    %14 = arith.truncf %9 : vector<8x128xf32> to vector<8x128xbf16>
    %cst_13 = arith.constant dense<0.000000e+00> : vector<8x128xf32>
    %15 = tpu.matmul %14, %11, %cst_13 {dimension_numbers = #tpu.dot_dimension_numbers<[1], [0], [0], [1], [0, 0, 1, 1], [], []>} : vector<8x128xbf16>, vector<128x128xbf16>, vector<8x128xf32> -> vector<8x128xf32>
    %16 = vector.broadcast %13 : vector<1x128xf32> to vector<8x128xf32>
    %17 = arith.addf %15, %16 : vector<8x128xf32>
    %cst_14 = arith.constant 0.000000e+00 : f32
    %18 = vector.broadcast %cst_14 : f32 to vector<8x128xf32>
    %19 = arith.maximumf %17, %18 : vector<8x128xf32>
    %c2 = arith.constant 2 : index
    %c0_15 = arith.constant 0 : index
    %c0_16 = arith.constant 0 : index
    %20 = vector.load %arg2[%c2, %c0_15, %c0_16] : memref<4x128x128xbf16, #tpu.memory_space<vmem>>, vector<1x128x128xbf16>
    %21 = vector.shape_cast %20 : vector<1x128x128xbf16> to vector<128x128xbf16>
    %c2_17 = arith.constant 2 : index
    %c0_18 = arith.constant 0 : index
    %c0_19 = arith.constant 0 : index
    %22 = vector.load %arg3[%c2_17, %c0_18, %c0_19] : memref<4x1x128xf32, #tpu.memory_space<vmem>>, vector<1x1x128xf32>
    %23 = vector.shape_cast %22 : vector<1x1x128xf32> to vector<1x128xf32>
    %24 = arith.truncf %19 : vector<8x128xf32> to vector<8x128xbf16>
    %cst_20 = arith.constant dense<0.000000e+00> : vector<8x128xf32>
    %25 = tpu.matmul %24, %21, %cst_20 {dimension_numbers = #tpu.dot_dimension_numbers<[1], [0], [0], [1], [0, 0, 1, 1], [], []>} : vector<8x128xbf16>, vector<128x128xbf16>, vector<8x128xf32> -> vector<8x128xf32>
    %26 = vector.broadcast %23 : vector<1x128xf32> to vector<8x128xf32>
    %27 = arith.addf %25, %26 : vector<8x128xf32>
    %cst_21 = arith.constant 0.000000e+00 : f32
    %28 = vector.broadcast %cst_21 : f32 to vector<8x128xf32>
    %29 = arith.maximumf %27, %28 : vector<8x128xf32>
    %c3 = arith.constant 3 : index
    %c0_22 = arith.constant 0 : index
    %c0_23 = arith.constant 0 : index
    %30 = vector.load %arg2[%c3, %c0_22, %c0_23] : memref<4x128x128xbf16, #tpu.memory_space<vmem>>, vector<1x128x128xbf16>
    %31 = vector.shape_cast %30 : vector<1x128x128xbf16> to vector<128x128xbf16>
    %c3_24 = arith.constant 3 : index
    %c0_25 = arith.constant 0 : index
    %c0_26 = arith.constant 0 : index
    %32 = vector.load %arg3[%c3_24, %c0_25, %c0_26] : memref<4x1x128xf32, #tpu.memory_space<vmem>>, vector<1x1x128xf32>
    %33 = vector.shape_cast %32 : vector<1x1x128xf32> to vector<1x128xf32>
    %34 = arith.truncf %29 : vector<8x128xf32> to vector<8x128xbf16>
    %cst_27 = arith.constant dense<0.000000e+00> : vector<8x128xf32>
    %35 = tpu.matmul %34, %31, %cst_27 {dimension_numbers = #tpu.dot_dimension_numbers<[1], [0], [0], [1], [0, 0, 1, 1], [], []>} : vector<8x128xbf16>, vector<128x128xbf16>, vector<8x128xf32> -> vector<8x128xf32>
    %36 = vector.broadcast %33 : vector<1x128xf32> to vector<8x128xf32>
    %37 = arith.addf %35, %36 : vector<8x128xf32>
    %c0_28 = arith.constant 0 : index
    %c0_29 = arith.constant 0 : index
    %38 = vector.load %arg4[%c0_28, %c0_29] : memref<8x128xf32, #tpu.memory_space<vmem>>, vector<8x128xf32>
    tpu.vector_store %arg4[%c0_28, %c0_29], %37 {strides = array<i32>} : memref<8x128xf32, #tpu.memory_space<vmem>>, vector<8x128xf32>,
    return
  }
  func.func @transform_0(%arg0: i32) -> (i32, i32) {
    %c0_i32 = arith.constant 0 : i32
    %c0_i32_0 = arith.constant 0 : i32
    return %arg0, %c0_i32 : i32, i32
  }
  func.func @transform_1(%arg0: i32) -> (i32, i32, i32) {
    %c0_i32 = arith.constant 0 : i32
    %c0_i32_0 = arith.constant 0 : i32
    %c0_i32_1 = arith.constant 0 : i32
    %c0_i32_2 = arith.constant 0 : i32
    return %c0_i32, %c0_i32_0, %c0_i32_1 : i32, i32, i32
  }
  func.func @transform_2(%arg0: i32) -> (i32, i32, i32) {
    %c0_i32 = arith.constant 0 : i32
    %c0_i32_0 = arith.constant 0 : i32
    %c0_i32_1 = arith.constant 0 : i32
    %c0_i32_2 = arith.constant 0 : i32
    return %c0_i32, %c0_i32_0, %c0_i32_1 : i32, i32, i32
  }
  func.func @transform_3(%arg0: i32) -> (i32, i32) {
    %c0_i32 = arith.constant 0 : i32
    %c0_i32_0 = arith.constant 0 : i32
    return %arg0, %c0_i32 : i32, i32
  }
}

</mosaic_0001>

<bundles_post_ra>
// kernel: toy_model_forward.1
= control target key start
LH: loop header
LB: loop body
LE: loop exit
PB: predicated region body
PF: predicated region fallthrough
CT: control target
= control target key end

     0   :  { %8 = vsyncpa [#allocation3], 0  ;;  %s706_s12 = smov [#allocation2]   ;;  %s792_s0 = inlined_call_operand.vmem [shape: bf16[8,128], index: 0, kind: input, shape index: {}]   ;;  %s793_s1 = inlined_call_operand.hbm [shape: bf16[4,128,128], index: 1, kind: input, shape index: {}]   ;;  %s794_s2 = inlined_call_operand.vmem [shape: f32[4,1,128], index: 2, kind: input, shape index: {}]   ;;  %s795_s3 = inlined_call_operand.vmem [shape: f32[8,128], index: 3, kind: output, shape index: {}]  }
   0x1   :  { %s16_s13 = sshll.u32 %s706_s12, 4  ;;  %s17_s13 = int_to_ptr.vmem [resolvable:$true] %s16_s13 }
   0x2   :  { %s692_s14 = scalar_lea.vmem %s17_s13, 4096  ;;  %p697_p1 = scmp.lt.s32.totalorder %s17_s13, %s17_s13 }
   0x3   :  { %p693_p0 = scmp.ne.s32.totalorder %s17_s13, %s692_s14  ;;  %p698_p2 = scmp.lt.s32.totalorder %s692_s14, %s692_s14 }
   0x5   :  { %p699_p3 = por %p698_p2, %p697_p1 }
   0x7   :  { %p700_p4 = pnand %p699_p3, %p693_p0 }
   0x9   :  { %703 = shalt.err (!%p700_p4)
}
   0xa   :  { %s707_s15 = smov 64   ;;  %s708_s16 = smov 4  }
   0xb   :  { %22 = dma.hbm_to_vmem [thread:$0]  %s793_s1, 4096, %s17_s13, [#allocation3], %s707_s15, %s707_s15, %s708_s16  }
   0xc   :  { %704 = dma.done.wait [#allocation3], 4096  }
   0xd   :  { %705 = vsyncadd [#allocation3], 4294963200  ;;  %v709_v0 = vmov 0.0   ;;  %vm710_vm0 = vmmov 0   ;;  %v652_v1 = vld [vmem:[#allocation2 + $0x38] sm:$0xff]   ;;  %v653_v2 = vld [vmem:[#allocation2 + $0x30] sm:$0xff]  }
   0xe   :  { %567 = vmatprep.subr.bf16.mxu0 %v709_v0  ;;  %583 = vmatprep.mubr.msk.bf16.mxu0 %vm710_vm0, %v709_v0  ;;  %v654_v3 = vld [vmem:[#allocation2 + $0x28] sm:$0xff]   ;;  %v660_v4 = vld [vmem:[#allocation2 + $0x78] sm:$0xff]   ;;  %v655_v5 = vld [vmem:[#allocation2 + $0x20] sm:$0xff]  }
   0xf   :  { %587 = vmatprep.subr.bf16.mxu1 %v709_v0  ;;  %603 = vmatprep.mubr.msk.bf16.mxu1 %vm710_vm0, %v709_v0  ;;  %v661_v6 = vld [vmem:[#allocation2 + $0x70] sm:$0xff]   ;;  %v656_v7 = vld [vmem:[#allocation2 + $0x18] sm:$0xff]   ;;  %v662_v8 = vld [vmem:[#allocation2 + $0x68] sm:$0xff]  }
  0x10   :  { %568 = vmatpush3.bf16.msra.mxu0 %v652_v1  ;;  %588 = vmatpush3.bf16.msra.mxu1 %v660_v4  ;;  %v657_v9 = vld [vmem:[#allocation2 + $0x10] sm:$0xff]   ;;  %v663_v10 = vld [vmem:[#allocation2 + $0x60] sm:$0xff]   ;;  %v658_v11 = vld [vmem:[#allocation2 + $0x8] sm:$0xff]  }
  0x11   :  { %569 = vmatprep.subr.bf16.mxu0 %v709_v0  ;;  %589 = vmatprep.subr.bf16.mxu1 %v709_v0  ;;  %v664_v12 = vld [vmem:[#allocation2 + $0x58] sm:$0xff]   ;;  %v659_v13 = vld [vmem:[#allocation2] sm:$0xff]   ;;  %v665_v14 = vld [vmem:[#allocation2 + $0x50] sm:$0xff]  }
  0x12   :  { %v29_v15 = vld [vmem:[%s792_s0] sm:$0xf]  ;;  %v666_v16 = vld [vmem:[#allocation2 + $0x48] sm:$0xff]   ;;  %v668_v18 = vld [vmem:[#allocation2 + $0xb8] sm:$0xff]  }
  0x13   :  { %v667_v17 = vld [vmem:[#allocation2 + $0x40] sm:$0xff]   ;;  %v669_v19 = vld [vmem:[#allocation2 + $0xb0] sm:$0xff]   ;;  %v670_v20 = vld [vmem:[#allocation2 + $0xa8] sm:$0xff]  }
  0x14   :  { %570 = vmatpush3.bf16.msra.mxu0 %v653_v2  ;;  %590 = vmatpush3.bf16.msra.mxu1 %v661_v6  ;;  %v671_v21 = vld [vmem:[#allocation2 + $0xa0] sm:$0xff]   ;;  %v672_v22 = vld [vmem:[#allocation2 + $0x98] sm:$0xff]   ;;  %v673_v23 = vld [vmem:[#allocation2 + $0x90] sm:$0xff]  }
  0x15   :  { %571 = vmatprep.subr.bf16.mxu0 %v709_v0  ;;  %591 = vmatprep.subr.bf16.mxu1 %v709_v0  ;;  %v492_v24 = vld [vmem:[%s794_s2] ss:$0 sm:$0xff]  ;;  %v674_v32 = vld [vmem:[#allocation2 + $0x88] sm:$0xff]   ;;  %v676_v34 = vld [vmem:[#allocation2 + $0xf8] sm:$0xff]  }
  0x16   :  { %v675_v33 = vld [vmem:[#allocation2 + $0x80] sm:$0xff]   ;;  %v677_v35 = vld [vmem:[#allocation2 + $0xf0] sm:$0xff]   ;;  %v678_v36 = vld [vmem:[#allocation2 + $0xe8] sm:$0xff]  }
  0x17   :  { %v679_v37 = vld [vmem:[#allocation2 + $0xe0] sm:$0xff]   ;;  %v680_v38 = vld [vmem:[#allocation2 + $0xd8] sm:$0xff]   ;;  %v681_v39 = vld [vmem:[#allocation2 + $0xd0] sm:$0xff]  }
  0x18   :  { %572 = vmatpush3.bf16.msra.mxu0 %v654_v3  ;;  %592 = vmatpush3.bf16.msra.mxu1 %v662_v8  ;;  %v502_v40 = vld [vmem:[%s794_s2 + $0x1] ss:$0 sm:$0xff]  ;;  %v682_v48 = vld [vmem:[#allocation2 + $0xc8] sm:$0xff]   ;;  %v512_v50 = vld [vmem:[%s794_s2 + $0x2] ss:$0 sm:$0xff] }
  0x19   :  { %573 = vmatprep.subr.bf16.mxu0 %v709_v0  ;;  %593 = vmatprep.subr.bf16.mxu1 %v709_v0  ;;  %v683_v49 = vld [vmem:[#allocation2 + $0xc0] sm:$0xff]  }
  0x1a   :  { %v522_v58 = vld [vmem:[%s794_s2 + $0x3] ss:$0 sm:$0xff] }
  0x1c   :  { %574 = vmatpush3.bf16.msra.mxu0 %v655_v5  ;;  %594 = vmatpush3.bf16.msra.mxu1 %v663_v10 }
  0x1d   :  { %575 = vmatprep.subr.bf16.mxu0 %v709_v0  ;;  %595 = vmatprep.subr.bf16.mxu1 %v709_v0 }
  0x20   :  { %576 = vmatpush3.bf16.msra.mxu0 %v656_v7  ;;  %596 = vmatpush3.bf16.msra.mxu1 %v664_v12 }
  0x21   :  { %577 = vmatprep.subr.bf16.mxu0 %v709_v0  ;;  %597 = vmatprep.subr.bf16.mxu1 %v709_v0 }
  0x24   :  { %578 = vmatpush3.bf16.msra.mxu0 %v657_v9  ;;  %598 = vmatpush3.bf16.msra.mxu1 %v665_v14 }
  0x25   :  { %579 = vmatprep.subr.bf16.mxu0 %v709_v0  ;;  %599 = vmatprep.subr.bf16.mxu1 %v709_v0 }
  0x28   :  { %580 = vmatpush3.bf16.msra.mxu0 %v658_v11  ;;  %600 = vmatpush3.bf16.msra.mxu1 %v666_v16 }
  0x29   :  { %581 = vmatprep.subr.bf16.mxu0 %v709_v0  ;;  %601 = vmatprep.subr.bf16.mxu1 %v709_v0 }
  0x2c   :  { %582 = vmatpush3.bf16.msra.mxu0 %v659_v13  ;;  %602 = vmatpush3.bf16.msra.mxu1 %v667_v17 }
  0x2d   :  { %607 = vmatprep.subr.bf16.mxu0 %v709_v0  ;;  %627 = vmatprep.subr.bf16.mxu1 %v709_v0 }
  0x2f   :  { %584 = vmatmul.mubr.bf16.vlgmr.msra.gmra.mxu0 %v29_v15 }
  0x30   :  { %623 = vmatprep.mubr.msk.bf16.mxu0 %vm710_vm0, %v709_v0  ;;  %608 = vmatpush3.bf16.msra.mxu0 %v668_v18 }
  0x31   :  { %609 = vmatprep.subr.bf16.mxu0 %v709_v0 }
  0x34   :  { %610 = vmatpush3.bf16.msra.mxu0 %v669_v19 }
  0x35   :  { %611 = vmatprep.subr.bf16.mxu0 %v709_v0 }
  0x38   :  { %612 = vmatpush3.bf16.msra.mxu0 %v670_v20 }
  0x39   :  { %613 = vmatprep.subr.bf16.mxu0 %v709_v0 }
  0x3c   :  { %614 = vmatpush3.bf16.msra.mxu0 %v671_v21 }
  0x3d   :  { %615 = vmatprep.subr.bf16.mxu0 %v709_v0 }
  0x40   :  { %616 = vmatpush3.bf16.msra.mxu0 %v672_v22 }
  0x41   :  { %617 = vmatprep.subr.bf16.mxu0 %v709_v0 }
  0x44   :  { %618 = vmatpush3.bf16.msra.mxu0 %v673_v23 }
  0x45   :  { %619 = vmatprep.subr.bf16.mxu0 %v709_v0 }
  0x48   :  { %620 = vmatpush3.bf16.msra.mxu0 %v674_v32 }
  0x49   :  { %621 = vmatprep.subr.bf16.mxu0 %v709_v0 }
  0x4c   :  { %622 = vmatpush3.bf16.msra.mxu0 %v675_v33 }
  0xef   :  { %v135_v25 = vpop.f32.mrf.mxu0 }
  0xf0   :  { %v136_v26 = vadd.f32 %v492_v24, %v135_v25 }
  0xf1   :  { %v585_v27 = vpop.f32.mrf.mxu0 }
  0xf2   :  { %v141_v28 = vmax.f32 %v136_v26, 0.0 }
  0xf3   :  { %v138_v29 = vpop.f32.mrf.mxu0 }
  0xf4   :  { %v161_v30 = vpack.c.bf16 %v141_v28, %v141_v28 }
  0xf5   :  { %v586_v31 = vpop.f32.mrf.mxu0 }
  0xf6   :  { %604 = vmatmul.mubr.bf16.vlgmr.msra.gmra.mxu1 %v161_v30 }
  0xf7   :  { %643 = vmatprep.mubr.msk.bf16.mxu1 %vm710_vm0, %v709_v0  ;;  %628 = vmatpush3.bf16.msra.mxu1 %v676_v34 }
  0xf8   :  { %629 = vmatprep.subr.bf16.mxu1 %v709_v0 }
  0xfb   :  { %630 = vmatpush3.bf16.msra.mxu1 %v677_v35 }
  0xfc   :  { %631 = vmatprep.subr.bf16.mxu1 %v709_v0 }
  0xff   :  { %632 = vmatpush3.bf16.msra.mxu1 %v678_v36 }
 0x100   :  { %633 = vmatprep.subr.bf16.mxu1 %v709_v0 }
 0x103   :  { %634 = vmatpush3.bf16.msra.mxu1 %v679_v37 }
 0x104   :  { %635 = vmatprep.subr.bf16.mxu1 %v709_v0 }
 0x107   :  { %636 = vmatpush3.bf16.msra.mxu1 %v680_v38 }
 0x108   :  { %637 = vmatprep.subr.bf16.mxu1 %v709_v0 }
 0x10b   :  { %638 = vmatpush3.bf16.msra.mxu1 %v681_v39 }
 0x10c   :  { %639 = vmatprep.subr.bf16.mxu1 %v709_v0 }
 0x10f   :  { %640 = vmatpush3.bf16.msra.mxu1 %v682_v48 }
 0x110   :  { %641 = vmatprep.subr.bf16.mxu1 %v709_v0 }
 0x113   :  { %642 = vmatpush3.bf16.msra.mxu1 %v683_v49 }
 0x1b6   :  { %v250_v41 = vpop.f32.mrf.mxu1 }
 0x1b7   :  { %v251_v42 = vadd.f32 %v502_v40, %v250_v41 }
 0x1b8   :  { %v605_v43 = vpop.f32.mrf.mxu1 }
 0x1b9   :  { %v256_v44 = vmax.f32 %v251_v42, 0.0 }
 0x1ba   :  { %v253_v45 = vpop.f32.mrf.mxu1 }
 0x1bb   :  { %v276_v46 = vpack.c.bf16 %v256_v44, %v256_v44 }
 0x1bc   :  { %v606_v47 = vpop.f32.mrf.mxu1 }
 0x1bd   :  { %624 = vmatmul.mubr.bf16.vlgmr.msra.gmra.mxu0 %v276_v46 }
 0x27d   :  { %v365_v51 = vpop.f32.mrf.mxu0 }
 0x27e   :  { %v366_v52 = vadd.f32 %v512_v50, %v365_v51 }
 0x27f   :  { %v625_v53 = vpop.f32.mrf.mxu0 }
 0x280   :  { %v371_v54 = vmax.f32 %v366_v52, 0.0 }
 0x281   :  { %v368_v55 = vpop.f32.mrf.mxu0 }
 0x282   :  { %v391_v56 = vpack.c.bf16 %v371_v54, %v371_v54 }
 0x283   :  { %v626_v57 = vpop.f32.mrf.mxu0 }
 0x284   :  { %644 = vmatmul.mubr.bf16.vlgmr.msra.gmra.mxu1 %v391_v56 }
 0x344   :  { %v480_v59 = vpop.f32.mrf.mxu1 }
 0x345   :  { %v481_v60 = vadd.f32 %v522_v58, %v480_v59 }
 0x346   :  { %v645_v61 = vpop.f32.mrf.mxu1 }
 0x347   :  { %486 = vst [vmem:[%s795_s3] sm:$0xff] %v481_v60 }
 0x348   :  { %v483_v62 = vpop.f32.mrf.mxu1 }
 0x34a   :  { %v646_v63 = vpop.f32.mrf.mxu1 }
 0x34b   :  { %491 = vsyncpa [#allocation3], 1 }

</bundles_post_ra>
